<compile_context>
chip_gen: v5e
topology: v5e:2x2
jax: 0.10.0
libtpu: 0.0.40
codegen_flags: <defaults>
</compile_context>

<pallas_src>
import jax
import jax.numpy as jnp
from jax.experimental import pallas as pl
from jax.experimental.pallas import tpu as pltpu


def actor_kernel(x_ref, w1_ref, w2_ref, w3_ref, w4_ref, b123_ref, b4_ref, o_ref):
    # Activations / element-wise math in f32; MXU operands in bf16 (f32 accumulate).
    b123 = b123_ref[...]                                     # (3, density) f32

    h = jnp.dot(x_ref[...].astype(jnp.bfloat16), w1_ref[...],
                preferred_element_type=jnp.float32)
    h = jnp.maximum(h + b123[0:1, :], 0.0)

    h = jnp.dot(h.astype(jnp.bfloat16), w2_ref[...],
                preferred_element_type=jnp.float32)
    h = jnp.maximum(h + b123[1:2, :], 0.0)

    h = jnp.dot(h.astype(jnp.bfloat16), w3_ref[...],
                preferred_element_type=jnp.float32)
    h = jnp.maximum(h + b123[2:3, :], 0.0)

    # b4's padded lanes hold -1e30 (w4 padding is zero), so padded columns vanish
    # in the softmax without any in-kernel iota/compare/select.
    logits = jnp.dot(h.astype(jnp.bfloat16), w4_ref[...],
                     preferred_element_type=jnp.float32) + b4_ref[...]

    m = jnp.max(logits, axis=-1, keepdims=True)
    e = jnp.exp(logits - m)
    denom = jnp.sum(e, axis=-1, keepdims=True)
    # Exact reciprocal: denom is only (tile, 1), so full precision is free and the
    # output rows sum to 1 to f32 precision (review correctness concern).
    o_ref[...] = (e * pl.reciprocal(denom, approx=False)).astype(o_ref.dtype)


def _round_up(x, m):
    return ((x + m - 1) // m) * m


def actor_forward(state, params, *, tile_b=1024, out_dtype=jnp.float32):
    """state: (B, D_in) float32. params: dict of f32 W stored as (in, out) and 1-D b.

    out_dtype=jnp.bfloat16 halves the output HBM writeback (largest win on v5e)
    when ~3 decimal digits of probability precision are acceptable.
    """
    B, d_in = state.shape
    density = params["w1"].shape[1]
    action_dim = params["w4"].shape[1]
    a_pad = _round_up(action_dim, 128)                       # lane-dense output

    # --- kernel operands: bf16 weights (MXU), f32 biases, padded layer-4 ---
    w1 = params["w1"].astype(jnp.bfloat16)
    w2 = params["w2"].astype(jnp.bfloat16)
    w3 = params["w3"].astype(jnp.bfloat16)
    w4 = jnp.zeros((density, a_pad), jnp.bfloat16)
    w4 = w4.at[:, :action_dim].set(params["w4"].astype(jnp.bfloat16))
    b123 = jnp.stack([params["b1"], params["b2"], params["b3"]], axis=0)  # (3, density)
    # Padding mask baked into the bias: padded logits = 0 + (-1e30) -> exp == 0.
    b4 = jnp.full((1, a_pad), -1e30, jnp.float32)
    b4 = b4.at[0, :action_dim].set(params["b4"].astype(jnp.float32))

    # --- batch handling: pad only to a sublane multiple (<= 7 extra rows) ---
    b_rows = _round_up(B, 8)
    if b_rows != B:
        state = jnp.pad(state, ((0, b_rows - B), (0, 0)))

    tile = max(8, (min(tile_b, b_rows) // 8) * 8)
    if b_rows >= 512:
        # Keep >=2 (balanced) grid steps on the "parallel" batch axis so both v7x
        # TensorCores get work on mid/large batches; no effect on v5e/v6e (1 TC).
        nsteps = max(2, pl.cdiv(b_rows, tile))
        tile = _round_up(pl.cdiv(b_rows, nsteps), 8)
    grid = (pl.cdiv(b_rows, tile),)   # ragged final tile handled by masked edge block

    def build_call(resident_spec):
        return pl.pallas_call(
            actor_kernel,
            out_shape=jax.ShapeDtypeStruct((b_rows, a_pad), out_dtype),
            grid_spec=pltpu.PrefetchScalarGridSpec(
                num_scalar_prefetch=0,
                grid=grid,
                in_specs=[
                    pl.BlockSpec((tile, d_in), lambda i: (i, 0)),   # tiled over batch
                    resident_spec(w1.shape),                        # resident weights
                    resident_spec(w2.shape),
                    resident_spec(w3.shape),
                    resident_spec(w4.shape),
                    resident_spec(b123.shape),
                    resident_spec(b4.shape),
                ],
                out_specs=pl.BlockSpec((tile, a_pad), lambda i: (i, 0)),
            ),
            compiler_params=pltpu.CompilerParams(
                dimension_semantics=("parallel",),
            ),
        )

    args = (state, w1, w2, w3, w4, b123, b4)
    try:
        # Grid-invariant weights/biases live whole in VMEM: one DMA, one buffer
        # (no double-buffering) -> halves their VMEM footprint, which keeps large
        # `density` weights inside v7x's 64 MiB VMEM without shrinking the batch tile.
        out = build_call(
            lambda s: pl.BlockSpec(memory_space=pltpu.MemorySpace.VMEM))(*args)
    except Exception:
        # Fallback for Pallas versions that reject whole-array VMEM operands:
        # full-shape blocked specs with a constant index_map (never re-DMA'd
        # across grid steps, but double-buffered by the auto-pipeliner).
        out = build_call(lambda s: pl.BlockSpec(s, lambda i: (0, 0)))(*args)

    return out[:B, :action_dim]


def init_actor_params(key, input_dim, action_dim, density):
    """Deterministic init mimicking PyTorch Linear default (U[-1/sqrt(fan_in), +])."""
    def linear(key, fan_in, fan_out):
        kw, kb = jax.random.split(key)
        bound = 1.0 / jnp.sqrt(fan_in)
        # stored as (in, out) == W.T of the PyTorch (out, in) weight
        w = jax.random.uniform(kw, (fan_in, fan_out), jnp.float32, -bound, bound)
        b = jax.random.uniform(kb, (fan_out,), jnp.float32, -bound, bound)
        return w, b

    k1, k2, k3, k4 = jax.random.split(key, 4)
    w1, b1 = linear(k1, input_dim, density)
    w2, b2 = linear(k2, density, density)
    w3, b3 = linear(k3, density, density)
    w4, b4 = linear(k4, density, action_dim)
    # TODO(synk): self.log_stds is a parameter unused in forward(); omitted from the kernel.
    return dict(w1=w1, b1=b1, w2=w2, b2=b2, w3=w3, b3=b3, w4=w4, b4=b4)


if __name__ == "__main__":
    # Small shapes consistent with the module's forward: batch of flat states.
    B, INPUT_DIM, ACTION_DIM, DENSITY = 8, 32, 8, 128

    key = jax.random.PRNGKey(0)
    kp, kx = jax.random.split(key)
    params = init_actor_params(kp, INPUT_DIM, ACTION_DIM, DENSITY)
    state = jax.random.normal(kx, (B, INPUT_DIM), jnp.float32)

    probs = jax.block_until_ready(actor_forward(state, params))
    assert probs.shape == (B, ACTION_DIM)
    assert bool(jnp.all(jnp.abs(jnp.sum(probs, axis=-1) - 1.0) < 1e-3))

    # Reference with identical bf16 matmul casting.
    def ref_forward(x, p):
        h = x
        for wi, bi in (("w1", "b1"), ("w2", "b2"), ("w3", "b3")):
            h = jnp.maximum(
                jnp.dot(h.astype(jnp.bfloat16), p[wi].astype(jnp.bfloat16),
                        preferred_element_type=jnp.float32) + p[bi], 0.0)
        logits = jnp.dot(h.astype(jnp.bfloat16), p["w4"].astype(jnp.bfloat16),
                         preferred_element_type=jnp.float32) + p["b4"]
        return jax.nn.softmax(logits, axis=-1)

    ref = jax.block_until_ready(ref_forward(state, params))
    assert bool(jnp.max(jnp.abs(probs - ref)) < 1e-2)

    # Exercise the ragged-batch / multi-step-grid / partial-edge-tile path and the
    # bf16 output-writeback option (v5e lever).
    B2 = 1300
    state2 = jax.random.normal(jax.random.PRNGKey(1), (B2, INPUT_DIM), jnp.float32)
    probs2 = jax.block_until_ready(
        actor_forward(state2, params, tile_b=512, out_dtype=jnp.bfloat16))
    assert probs2.shape == (B2, ACTION_DIM)
    sums2 = jnp.sum(probs2.astype(jnp.float32), axis=-1)
    assert bool(jnp.all(jnp.abs(sums2 - 1.0) < 2e-2))

    print("KERNEL_OK")
</pallas_src>

<mosaic_0001>
module attributes {stable_mosaic.version = 11 : i64} {
  func.func @actor_kernel(%arg0: i32, %arg1: memref<8x32xf32, #tpu.memory_space<vmem>>, %arg2: memref<32x128xbf16, #tpu.memory_space<vmem>>, %arg3: memref<128x128xbf16, #tpu.memory_space<vmem>>, %arg4: memref<128x128xbf16, #tpu.memory_space<vmem>>, %arg5: memref<128x128xbf16, #tpu.memory_space<vmem>>, %arg6: memref<3x128xf32, #tpu.memory_space<vmem>>, %arg7: memref<1x128xf32, #tpu.memory_space<vmem>>, %arg8: memref<8x128xf32, #tpu.memory_space<vmem>>) attributes {dimension_semantics = [#tpu.dimension_semantics<parallel>], iteration_bounds = array<i64: 1>, scalar_prefetch = 0 : i64, scratch_operands = 0 : i64, tpu.core_type = #tpu.core_type<tc>, window_params = [{transform_indices = @transform_0, window_bounds = array<i64: 8, 32>}, {pipeline_mode = #tpu.pipeline_mode<synchronous>, transform_indices = @transform_1, window_bounds = array<i64: 32, 128>}, {pipeline_mode = #tpu.pipeline_mode<synchronous>, transform_indices = @transform_2, window_bounds = array<i64: 128, 128>}, {pipeline_mode = #tpu.pipeline_mode<synchronous>, transform_indices = @transform_3, window_bounds = array<i64: 128, 128>}, {pipeline_mode = #tpu.pipeline_mode<synchronous>, transform_indices = @transform_4, window_bounds = array<i64: 128, 128>}, {pipeline_mode = #tpu.pipeline_mode<synchronous>, transform_indices = @transform_5, window_bounds = array<i64: 3, 128>}, {pipeline_mode = #tpu.pipeline_mode<synchronous>, transform_indices = @transform_6, window_bounds = array<i64: 1, 128>}, {transform_indices = @transform_7, window_bounds = array<i64: 8, 128>}]} {
    %c0 = arith.constant 0 : index
    %c0_0 = arith.constant 0 : index
    %0 = vector.load %arg6[%c0, %c0_0] : memref<3x128xf32, #tpu.memory_space<vmem>>, vector<3x128xf32>
    %c0_1 = arith.constant 0 : index
    %c0_2 = arith.constant 0 : index
    %1 = vector.load %arg1[%c0_1, %c0_2] : memref<8x32xf32, #tpu.memory_space<vmem>>, vector<8x32xf32>
    %2 = arith.truncf %1 : vector<8x32xf32> to vector<8x32xbf16>
    %c0_3 = arith.constant 0 : index
    %c0_4 = arith.constant 0 : index
    %3 = vector.load %arg2[%c0_3, %c0_4] : memref<32x128xbf16, #tpu.memory_space<vmem>>, vector<32x128xbf16>
    %cst = arith.constant dense<0.000000e+00> : vector<8x128xf32>
    %4 = tpu.matmul %2, %3, %cst {dimension_numbers = #tpu.dot_dimension_numbers<[1], [0], [0], [1], [0, 0, 1, 1], [], []>} : vector<8x32xbf16>, vector<32x128xbf16>, vector<8x128xf32> -> vector<8x128xf32>
    %5 = vector.extract_strided_slice %0 {offsets = [0, 0], sizes = [1, 128], strides = [1, 1]} : vector<3x128xf32> to vector<1x128xf32>
    %6 = vector.broadcast %5 : vector<1x128xf32> to vector<8x128xf32>
    %7 = arith.addf %4, %6 : vector<8x128xf32>
    %cst_5 = arith.constant 0.000000e+00 : f32
    %8 = vector.broadcast %cst_5 : f32 to vector<8x128xf32>
    %9 = arith.maximumf %7, %8 : vector<8x128xf32>
    %10 = arith.truncf %9 : vector<8x128xf32> to vector<8x128xbf16>
    %c0_6 = arith.constant 0 : index
    %c0_7 = arith.constant 0 : index
    %11 = vector.load %arg3[%c0_6, %c0_7] : memref<128x128xbf16, #tpu.memory_space<vmem>>, vector<128x128xbf16>
    %cst_8 = arith.constant dense<0.000000e+00> : vector<8x128xf32>
    %12 = tpu.matmul %10, %11, %cst_8 {dimension_numbers = #tpu.dot_dimension_numbers<[1], [0], [0], [1], [0, 0, 1, 1], [], []>} : vector<8x128xbf16>, vector<128x128xbf16>, vector<8x128xf32> -> vector<8x128xf32>
    %13 = vector.extract_strided_slice %0 {offsets = [1, 0], sizes = [1, 128], strides = [1, 1]} : vector<3x128xf32> to vector<1x128xf32>
    %14 = vector.broadcast %13 : vector<1x128xf32> to vector<8x128xf32>
    %15 = arith.addf %12, %14 : vector<8x128xf32>
    %cst_9 = arith.constant 0.000000e+00 : f32
    %16 = vector.broadcast %cst_9 : f32 to vector<8x128xf32>
    %17 = arith.maximumf %15, %16 : vector<8x128xf32>
    %18 = arith.truncf %17 : vector<8x128xf32> to vector<8x128xbf16>
    %c0_10 = arith.constant 0 : index
    %c0_11 = arith.constant 0 : index
    %19 = vector.load %arg4[%c0_10, %c0_11] : memref<128x128xbf16, #tpu.memory_space<vmem>>, vector<128x128xbf16>
    %cst_12 = arith.constant dense<0.000000e+00> : vector<8x128xf32>
    %20 = tpu.matmul %18, %19, %cst_12 {dimension_numbers = #tpu.dot_dimension_numbers<[1], [0], [0], [1], [0, 0, 1, 1], [], []>} : vector<8x128xbf16>, vector<128x128xbf16>, vector<8x128xf32> -> vector<8x128xf32>
    %21 = vector.extract_strided_slice %0 {offsets = [2, 0], sizes = [1, 128], strides = [1, 1]} : vector<3x128xf32> to vector<1x128xf32>
    %22 = vector.broadcast %21 : vector<1x128xf32> to vector<8x128xf32>
    %23 = arith.addf %20, %22 : vector<8x128xf32>
    %cst_13 = arith.constant 0.000000e+00 : f32
    %24 = vector.broadcast %cst_13 : f32 to vector<8x128xf32>
    %25 = arith.maximumf %23, %24 : vector<8x128xf32>
    %26 = arith.truncf %25 : vector<8x128xf32> to vector<8x128xbf16>
    %c0_14 = arith.constant 0 : index
    %c0_15 = arith.constant 0 : index
    %27 = vector.load %arg5[%c0_14, %c0_15] : memref<128x128xbf16, #tpu.memory_space<vmem>>, vector<128x128xbf16>
    %cst_16 = arith.constant dense<0.000000e+00> : vector<8x128xf32>
    %28 = tpu.matmul %26, %27, %cst_16 {dimension_numbers = #tpu.dot_dimension_numbers<[1], [0], [0], [1], [0, 0, 1, 1], [], []>} : vector<8x128xbf16>, vector<128x128xbf16>, vector<8x128xf32> -> vector<8x128xf32>
    %c0_17 = arith.constant 0 : index
    %c0_18 = arith.constant 0 : index
    %29 = vector.load %arg7[%c0_17, %c0_18] : memref<1x128xf32, #tpu.memory_space<vmem>>, vector<1x128xf32>
    %30 = vector.broadcast %29 : vector<1x128xf32> to vector<8x128xf32>
    %31 = arith.addf %28, %30 : vector<8x128xf32>
    %cst_19 = arith.constant dense<0xFF800000> : vector<8xf32>
    %32 = vector.multi_reduction <maximumf>, %31, %cst_19 [1] : vector<8x128xf32> to vector<8xf32>
    %33 = vector.shape_cast %32 : vector<8xf32> to vector<8x1xf32>
    %34 = vector.broadcast %33 : vector<8x1xf32> to vector<8x128xf32>
    %35 = arith.subf %31, %34 : vector<8x128xf32>
    %36 = math.exp %35 : vector<8x128xf32>
    %cst_20 = arith.constant dense<0.000000e+00> : vector<8xf32>
    %37 = vector.multi_reduction <add>, %36, %cst_20 [1] : vector<8x128xf32> to vector<8xf32>
    %38 = vector.shape_cast %37 : vector<8xf32> to vector<8x1xf32>
    %39 = tpu.reciprocal %38 : vector<8x1xf32> -> vector<8x1xf32>
    %40 = vector.broadcast %39 : vector<8x1xf32> to vector<8x128xf32>
    %41 = arith.mulf %36, %40 : vector<8x128xf32>
    %c0_21 = arith.constant 0 : index
    %c0_22 = arith.constant 0 : index
    %42 = vector.load %arg8[%c0_21, %c0_22] : memref<8x128xf32, #tpu.memory_space<vmem>>, vector<8x128xf32>
    tpu.vector_store %arg8[%c0_21, %c0_22], %41 {strides = array<i32>} : memref<8x128xf32, #tpu.memory_space<vmem>>, vector<8x128xf32>,
    return
  }
  func.func @transform_0(%arg0: i32) -> (i32, i32) {
    %c0_i32 = arith.constant 0 : i32
    %c0_i32_0 = arith.constant 0 : i32
    return %arg0, %c0_i32 : i32, i32
  }
  func.func @transform_1(%arg0: i32) -> (i32, i32) {
    %c0_i32 = arith.constant 0 : i32
    %c0_i32_0 = arith.constant 0 : i32
    %c0_i32_1 = arith.constant 0 : i32
    return %c0_i32, %c0_i32_0 : i32, i32
  }
  func.func @transform_2(%arg0: i32) -> (i32, i32) {
    %c0_i32 = arith.constant 0 : i32
    %c0_i32_0 = arith.constant 0 : i32
    %c0_i32_1 = arith.constant 0 : i32
    return %c0_i32, %c0_i32_0 : i32, i32
  }
  func.func @transform_3(%arg0: i32) -> (i32, i32) {
    %c0_i32 = arith.constant 0 : i32
    %c0_i32_0 = arith.constant 0 : i32
    %c0_i32_1 = arith.constant 0 : i32
    return %c0_i32, %c0_i32_0 : i32, i32
  }
  func.func @transform_4(%arg0: i32) -> (i32, i32) {
    %c0_i32 = arith.constant 0 : i32
    %c0_i32_0 = arith.constant 0 : i32
    %c0_i32_1 = arith.constant 0 : i32
    return %c0_i32, %c0_i32_0 : i32, i32
  }
  func.func @transform_5(%arg0: i32) -> (i32, i32) {
    %c0_i32 = arith.constant 0 : i32
    %c0_i32_0 = arith.constant 0 : i32
    %c0_i32_1 = arith.constant 0 : i32
    return %c0_i32, %c0_i32_0 : i32, i32
  }
  func.func @transform_6(%arg0: i32) -> (i32, i32) {
    %c0_i32 = arith.constant 0 : i32
    %c0_i32_0 = arith.constant 0 : i32
    %c0_i32_1 = arith.constant 0 : i32
    return %c0_i32, %c0_i32_0 : i32, i32
  }
  func.func @transform_7(%arg0: i32) -> (i32, i32) {
    %c0_i32 = arith.constant 0 : i32
    %c0_i32_0 = arith.constant 0 : i32
    return %arg0, %c0_i32 : i32, i32
  }
}

module attributes {stable_mosaic.version = 11 : i64} {
  func.func @actor_kernel(%arg0: i32, %arg1: memref<8x32xf32, #tpu.memory_space<vmem>>, %arg2: memref<32x128xbf16, #tpu.memory_space<vmem>>, %arg3: memref<128x128xbf16, #tpu.memory_space<vmem>>, %arg4: memref<128x128xbf16, #tpu.memory_space<vmem>>, %arg5: memref<128x128xbf16, #tpu.memory_space<vmem>>, %arg6: memref<3x128xf32, #tpu.memory_space<vmem>>, %arg7: memref<1x128xf32, #tpu.memory_space<vmem>>, %arg8: memref<8x128xf32, #tpu.memory_space<vmem>>) attributes {dimension_semantics = [#tpu.dimension_semantics<parallel>], iteration_bounds = array<i64: 1>, scalar_prefetch = 0 : i64, scratch_operands = 0 : i64, tpu.core_type = #tpu.core_type<tc>, window_params = [{transform_indices = @transform_0, window_bounds = array<i64: 8, 32>}, {pipeline_mode = #tpu.pipeline_mode<synchronous>, transform_indices = @transform_1, window_bounds = array<i64: 32, 128>}, {pipeline_mode = #tpu.pipeline_mode<synchronous>, transform_indices = @transform_2, window_bounds = array<i64: 128, 128>}, {pipeline_mode = #tpu.pipeline_mode<synchronous>, transform_indices = @transform_3, window_bounds = array<i64: 128, 128>}, {pipeline_mode = #tpu.pipeline_mode<synchronous>, transform_indices = @transform_4, window_bounds = array<i64: 128, 128>}, {pipeline_mode = #tpu.pipeline_mode<synchronous>, transform_indices = @transform_5, window_bounds = array<i64: 3, 128>}, {pipeline_mode = #tpu.pipeline_mode<synchronous>, transform_indices = @transform_6, window_bounds = array<i64: 1, 128>}, {transform_indices = @transform_7, window_bounds = array<i64: 8, 128>}]} {
    %c0 = arith.constant 0 : index
    %c0_0 = arith.constant 0 : index
    %0 = vector.load %arg6[%c0, %c0_0] : memref<3x128xf32, #tpu.memory_space<vmem>>, vector<3x128xf32>
    %c0_1 = arith.constant 0 : index
    %c0_2 = arith.constant 0 : index
    %1 = vector.load %arg1[%c0_1, %c0_2] : memref<8x32xf32, #tpu.memory_space<vmem>>, vector<8x32xf32>
    %2 = arith.truncf %1 : vector<8x32xf32> to vector<8x32xbf16>
    %c0_3 = arith.constant 0 : index
    %c0_4 = arith.constant 0 : index
    %3 = vector.load %arg2[%c0_3, %c0_4] : memref<32x128xbf16, #tpu.memory_space<vmem>>, vector<32x128xbf16>
    %cst = arith.constant dense<0.000000e+00> : vector<8x128xf32>
    %4 = tpu.matmul %2, %3, %cst {dimension_numbers = #tpu.dot_dimension_numbers<[1], [0], [0], [1], [0, 0, 1, 1], [], []>} : vector<8x32xbf16>, vector<32x128xbf16>, vector<8x128xf32> -> vector<8x128xf32>
    %5 = vector.extract_strided_slice %0 {offsets = [0, 0], sizes = [1, 128], strides = [1, 1]} : vector<3x128xf32> to vector<1x128xf32>
    %6 = vector.broadcast %5 : vector<1x128xf32> to vector<8x128xf32>
    %7 = arith.addf %4, %6 : vector<8x128xf32>
    %cst_5 = arith.constant 0.000000e+00 : f32
    %8 = vector.broadcast %cst_5 : f32 to vector<8x128xf32>
    %9 = arith.maximumf %7, %8 : vector<8x128xf32>
    %10 = arith.truncf %9 : vector<8x128xf32> to vector<8x128xbf16>
    %c0_6 = arith.constant 0 : index
    %c0_7 = arith.constant 0 : index
    %11 = vector.load %arg3[%c0_6, %c0_7] : memref<128x128xbf16, #tpu.memory_space<vmem>>, vector<128x128xbf16>
    %cst_8 = arith.constant dense<0.000000e+00> : vector<8x128xf32>
    %12 = tpu.matmul %10, %11, %cst_8 {dimension_numbers = #tpu.dot_dimension_numbers<[1], [0], [0], [1], [0, 0, 1, 1], [], []>} : vector<8x128xbf16>, vector<128x128xbf16>, vector<8x128xf32> -> vector<8x128xf32>
    %13 = vector.extract_strided_slice %0 {offsets = [1, 0], sizes = [1, 128], strides = [1, 1]} : vector<3x128xf32> to vector<1x128xf32>
    %14 = vector.broadcast %13 : vector<1x128xf32> to vector<8x128xf32>
    %15 = arith.addf %12, %14 : vector<8x128xf32>
    %cst_9 = arith.constant 0.000000e+00 : f32
    %16 = vector.broadcast %cst_9 : f32 to vector<8x128xf32>
    %17 = arith.maximumf %15, %16 : vector<8x128xf32>
    %18 = arith.truncf %17 : vector<8x128xf32> to vector<8x128xbf16>
    %c0_10 = arith.constant 0 : index
    %c0_11 = arith.constant 0 : index
    %19 = vector.load %arg4[%c0_10, %c0_11] : memref<128x128xbf16, #tpu.memory_space<vmem>>, vector<128x128xbf16>
    %cst_12 = arith.constant dense<0.000000e+00> : vector<8x128xf32>
    %20 = tpu.matmul %18, %19, %cst_12 {dimension_numbers = #tpu.dot_dimension_numbers<[1], [0], [0], [1], [0, 0, 1, 1], [], []>} : vector<8x128xbf16>, vector<128x128xbf16>, vector<8x128xf32> -> vector<8x128xf32>
    %21 = vector.extract_strided_slice %0 {offsets = [2, 0], sizes = [1, 128], strides = [1, 1]} : vector<3x128xf32> to vector<1x128xf32>
    %22 = vector.broadcast %21 : vector<1x128xf32> to vector<8x128xf32>
    %23 = arith.addf %20, %22 : vector<8x128xf32>
    %cst_13 = arith.constant 0.000000e+00 : f32
    %24 = vector.broadcast %cst_13 : f32 to vector<8x128xf32>
    %25 = arith.maximumf %23, %24 : vector<8x128xf32>
    %26 = arith.truncf %25 : vector<8x128xf32> to vector<8x128xbf16>
    %c0_14 = arith.constant 0 : index
    %c0_15 = arith.constant 0 : index
    %27 = vector.load %arg5[%c0_14, %c0_15] : memref<128x128xbf16, #tpu.memory_space<vmem>>, vector<128x128xbf16>
    %cst_16 = arith.constant dense<0.000000e+00> : vector<8x128xf32>
    %28 = tpu.matmul %26, %27, %cst_16 {dimension_numbers = #tpu.dot_dimension_numbers<[1], [0], [0], [1], [0, 0, 1, 1], [], []>} : vector<8x128xbf16>, vector<128x128xbf16>, vector<8x128xf32> -> vector<8x128xf32>
    %c0_17 = arith.constant 0 : index
    %c0_18 = arith.constant 0 : index
    %29 = vector.load %arg7[%c0_17, %c0_18] : memref<1x128xf32, #tpu.memory_space<vmem>>, vector<1x128xf32>
    %30 = vector.broadcast %29 : vector<1x128xf32> to vector<8x128xf32>
    %31 = arith.addf %28, %30 : vector<8x128xf32>
    %cst_19 = arith.constant dense<0xFF800000> : vector<8xf32>
    %32 = vector.multi_reduction <maximumf>, %31, %cst_19 [1] : vector<8x128xf32> to vector<8xf32>
    %33 = vector.shape_cast %32 : vector<8xf32> to vector<8x1xf32>
    %34 = vector.broadcast %33 : vector<8x1xf32> to vector<8x128xf32>
    %35 = arith.subf %31, %34 : vector<8x128xf32>
    %36 = math.exp %35 : vector<8x128xf32>
    %cst_20 = arith.constant dense<0.000000e+00> : vector<8xf32>
    %37 = vector.multi_reduction <add>, %36, %cst_20 [1] : vector<8x128xf32> to vector<8xf32>
    %38 = vector.shape_cast %37 : vector<8xf32> to vector<8x1xf32>
    %39 = tpu.reciprocal %38 : vector<8x1xf32> -> vector<8x1xf32>
    %40 = vector.broadcast %39 : vector<8x1xf32> to vector<8x128xf32>
    %41 = arith.mulf %36, %40 : vector<8x128xf32>
    %c0_21 = arith.constant 0 : index
    %c0_22 = arith.constant 0 : index
    %42 = vector.load %arg8[%c0_21, %c0_22] : memref<8x128xf32, #tpu.memory_space<vmem>>, vector<8x128xf32>
    tpu.vector_store %arg8[%c0_21, %c0_22], %41 {strides = array<i32>} : memref<8x128xf32, #tpu.memory_space<vmem>>, vector<8x128xf32>,
    return
  }
  func.func @transform_0(%arg0: i32) -> (i32, i32) {
    %c0_i32 = arith.constant 0 : i32
    %c0_i32_0 = arith.constant 0 : i32
    return %arg0, %c0_i32 : i32, i32
  }
  func.func @transform_1(%arg0: i32) -> (i32, i32) {
    %c0_i32 = arith.constant 0 : i32
    %c0_i32_0 = arith.constant 0 : i32
    %c0_i32_1 = arith.constant 0 : i32
    return %c0_i32, %c0_i32_0 : i32, i32
  }
  func.func @transform_2(%arg0: i32) -> (i32, i32) {
    %c0_i32 = arith.constant 0 : i32
    %c0_i32_0 = arith.constant 0 : i32
    %c0_i32_1 = arith.constant 0 : i32
    return %c0_i32, %c0_i32_0 : i32, i32
  }
  func.func @transform_3(%arg0: i32) -> (i32, i32) {
    %c0_i32 = arith.constant 0 : i32
    %c0_i32_0 = arith.constant 0 : i32
    %c0_i32_1 = arith.constant 0 : i32
    return %c0_i32, %c0_i32_0 : i32, i32
  }
  func.func @transform_4(%arg0: i32) -> (i32, i32) {
    %c0_i32 = arith.constant 0 : i32
    %c0_i32_0 = arith.constant 0 : i32
    %c0_i32_1 = arith.constant 0 : i32
    return %c0_i32, %c0_i32_0 : i32, i32
  }
  func.func @transform_5(%arg0: i32) -> (i32, i32) {
    %c0_i32 = arith.constant 0 : i32
    %c0_i32_0 = arith.constant 0 : i32
    %c0_i32_1 = arith.constant 0 : i32
    return %c0_i32, %c0_i32_0 : i32, i32
  }
  func.func @transform_6(%arg0: i32) -> (i32, i32) {
    %c0_i32 = arith.constant 0 : i32
    %c0_i32_0 = arith.constant 0 : i32
    %c0_i32_1 = arith.constant 0 : i32
    return %c0_i32, %c0_i32_0 : i32, i32
  }
  func.func @transform_7(%arg0: i32) -> (i32, i32) {
    %c0_i32 = arith.constant 0 : i32
    %c0_i32_0 = arith.constant 0 : i32
    return %arg0, %c0_i32 : i32, i32
  }
}

</mosaic_0001>

<bundles_post_ra>
// kernel: tpu_custom_call.1
= control target key start
LH: loop header
LB: loop body
LE: loop exit
PB: predicated region body
PF: predicated region fallthrough
CT: control target
= control target key end

     0   :  { %12 = vsyncpa [#allocation3], 0  ;;  %s794_s0 = inlined_call_operand.hbm [shape: f32[8,32], index: 0, kind: input, shape index: {}]   ;;  %s795_s1 = inlined_call_operand.hbm [shape: bf16[32,128], index: 1, kind: input, shape index: {}]   ;;  %s796_s2 = inlined_call_operand.hbm [shape: bf16[128,128], index: 2, kind: input, shape index: {}]   ;;  %s797_s3 = inlined_call_operand.hbm [shape: bf16[128,128], index: 3, kind: input, shape index: {}]   ;;  %s798_s4 = inlined_call_operand.hbm [shape: bf16[128,128], index: 4, kind: input, shape index: {}]   ;;  %s799_s5 = inlined_call_operand.vmem [shape: f32[3,128], index: 5, kind: input, shape index: {}]   ;;  %s800_s6 = inlined_call_operand.vmem [shape: f32[1,128], index: 6, kind: input, shape index: {}]   ;;  %s801_s7 = inlined_call_operand.hbm [shape: f32[8,128], index: 7, kind: output, shape index: {}]  }
   0x1   :  { %13 = vsyncpa [#allocation6], 0 }
   0x2   :  { %14 = vsyncpa [#allocation9], 0  ;;  %s31_s26 = sshll.u32 %s795_s1, 4  ;;  %s32_s26 = int_to_ptr.hbm [resolvable:$true] %s31_s26 }
   0x3   :  { %15 = vsyncpa [#allocation4], 0  ;;  %s722_s27 = smov [#allocation5]   ;;  %s57_s8 = sshll.u32 %s797_s3, 4  ;;  %s58_s8 = int_to_ptr.hbm [resolvable:$true] %s57_s8 }
   0x4   :  { %s33_s28 = sshll.u32 %s722_s27, 4  ;;  %s723_s9 = smov 64   ;;  %s34_s28 = int_to_ptr.vmem [resolvable:$true] %s33_s28 }
   0x5   :  { %s724_s10 = smov 4   ;;  %s725_s11 = smov [#allocation8]  }
   0x6   :  { %39 = dma.hbm_to_vmem [thread:$0]  %s32_s26, 256, %s34_s28, [#allocation6], %s723_s9, %s723_s9, %s724_s10  }
   0x7   :  { %s59_s12 = sshll.u32 %s725_s11, 4  ;;  %s21_s15 = sshll.u32 %s794_s0, 4  ;;  %s60_s12 = int_to_ptr.vmem [resolvable:$true] %s59_s12  ;;  %s22_s15 = int_to_ptr.hbm [resolvable:$true] %s21_s15 }
   0x8   :  { %65 = dma.hbm_to_vmem [thread:$0]  %s58_s8, 1024, %s60_s12, [#allocation9], %s723_s9, %s723_s9, %s724_s10  }
   0x9   :  { %s44_s17 = sshll.u32 %s796_s2, 4  ;;  %s726_s18 = smov [#allocation2]   ;;  %s45_s17 = int_to_ptr.hbm [resolvable:$true] %s44_s17 }
   0xa   :  { %s23_s19 = sshll.u32 %s726_s18, 4  ;;  %s727_s3 = smov [#allocation7]   ;;  %s24_s19 = int_to_ptr.vmem [resolvable:$true] %s23_s19 }
   0xb   :  { %26 = dma.hbm_to_vmem [thread:$0]  %s22_s15, 128, %s24_s19, [#allocation3]  }
   0xc   :  { %s46_s20 = sshll.u32 %s727_s3, 4  ;;  %s70_s23 = sshll.u32 %s798_s4, 4  ;;  %s47_s20 = int_to_ptr.vmem [resolvable:$true] %s46_s20  ;;  %s71_s23 = int_to_ptr.hbm [resolvable:$true] %s70_s23 }
   0xd   :  { %52 = dma.hbm_to_vmem [thread:$0]  %s45_s17, 1024, %s47_s20, [#allocation6], %s723_s9, %s723_s9, %s724_s10  }
   0xe   :  { %s728_s0 = smov [#allocation10]  }
   0xf   :  { %s72_s24 = sshll.u32 %s728_s0, 4  ;;  %s73_s24 = int_to_ptr.vmem [resolvable:$true] %s72_s24 }
  0x10   :  { %78 = dma.hbm_to_vmem [thread:$0]  %s71_s23, 1024, %s73_s24, [#allocation9], %s723_s9, %s723_s9, %s724_s10  }
  0x11   :  { %714 = dma.done.wait [#allocation3], 128  }
  0x12   :  { %715 = vsyncadd [#allocation3], 4294967168 }
  0x13   :  { %716 = dma.done.wait [#allocation6], 1280  }
  0x14   :  { %717 = vsyncadd [#allocation6], 4294966016 }
  0x15   :  { %718 = dma.done.wait [#allocation9], 2048  }
  0x16   :  { %719 = vsyncadd [#allocation9], 4294965248  ;;  %v532_v0 = vld [vmem:[#allocation5 + $0x8] sm:$0xff]  ;;  %v531_v2 = vld [vmem:[#allocation5] sm:$0xff]  ;;  %vm124_vm0 = vcmask 261120   ;;  %s414_s29 = sshll.u32 %s801_s7, 4  ;;  %s415_s29 = int_to_ptr.hbm [resolvable:$true] %s414_s29 }
  0x17   :  { %v540_v1 = vld [vmem:[#allocation7 + $0x38] sm:$0xff]  ;;  %134 = vmatpush.bf16.msra.mxu0 %v532_v0  ;;  %v105_v3 = vld [vmem:[#allocation2] sm:$0xff]  ;;  %v539_v4 = vld [vmem:[#allocation7 + $0x30] sm:$0xff] }
  0x18   :  { %208 = vmatpush.bf16.msra.mxu1 %v540_v1  ;;  %v106_v5 = vpack.c.bf16 %v105_v3, %v105_v3  ;;  %v538_v6 = vld [vmem:[#allocation7 + $0x28] sm:$0xff]  ;;  %v537_v7 = vld [vmem:[#allocation7 + $0x20] sm:$0xff]  ;;  %v536_v8 = vld [vmem:[#allocation7 + $0x18] sm:$0xff] }
  0x19   :  { %v535_v9 = vld [vmem:[#allocation7 + $0x10] sm:$0xff]  ;;  %v534_v10 = vld [vmem:[#allocation7 + $0x8] sm:$0xff]  ;;  %v533_v11 = vld [vmem:[#allocation7] sm:$0xff] }
  0x1a   :  { %v548_v12 = vld [vmem:[#allocation8 + $0x38] sm:$0xff]  ;;  %v547_v13 = vld [vmem:[#allocation8 + $0x30] sm:$0xff]  ;;  %v546_v14 = vld [vmem:[#allocation8 + $0x28] sm:$0xff] }
  0x1b   :  { %135 = vmatpush.bf16.msra.mxu0 %v531_v2  ;;  %288 = vmatpush.bf16.msra.mxu2 %v548_v12  ;;  %v545_v15 = vld [vmem:[#allocation8 + $0x20] sm:$0xff]  ;;  %v544_v16 = vld [vmem:[#allocation8 + $0x18] sm:$0xff]  ;;  %v104_v17 = vld [vmem:[%s799_s5] sm:$0x7] }
  0x1c   :  { %209 = vmatpush.bf16.msra.mxu1 %v539_v4  ;;  %v543_v18 = vld [vmem:[#allocation8 + $0x10] sm:$0xff]  ;;  %v111_v19 = vperm.slane %v104_v17, 0  ;;  %v542_v25 = vld [vmem:[#allocation8 + $0x8] sm:$0xff]  ;;  %v541_v26 = vld [vmem:[#allocation8] sm:$0xff]  ;;  %v159_v33 = vperm.slane %v104_v17, 1  ;;  %v239_v41 = vperm.slane %v104_v17, 2 }
  0x1d   :  { %v556_v27 = vld [vmem:[#allocation10 + $0x38] sm:$0xff]  ;;  %v555_v28 = vld [vmem:[#allocation10 + $0x30] sm:$0xff]  ;;  %v554_v29 = vld [vmem:[#allocation10 + $0x28] sm:$0xff] }
  0x1e   :  { %434 = vmatmul.msk.bf16.vlgmr.msra.gmra.mxu0 %vm124_vm0, %v106_v5  ;;  %371 = vmatpush.bf16.msra.mxu3 %v556_v27  ;;  %v553_v30 = vld [vmem:[#allocation10 + $0x20] sm:$0xff]  ;;  %v552_v31 = vld [vmem:[#allocation10 + $0x18] sm:$0xff]  ;;  %v551_v32 = vld [vmem:[#allocation10 + $0x10] sm:$0xff] }
  0x1f   :  { %289 = vmatpush.bf16.msra.mxu2 %v547_v13  ;;  %v550_v39 = vld [vmem:[#allocation10 + $0x8] sm:$0xff]  ;;  %v549_v40 = vld [vmem:[#allocation10] sm:$0xff] }
  0x20   :  { %210 = vmatpush.bf16.msra.mxu1 %v538_v6  ;;  %v565_v47 = vld [vmem:[%s800_s6] ss:$0 sm:$0xff]  ;;  %s729_s6 = smov [#allocation11]  }
  0x21   :  { %s412_s26 = sshll.u32 %s729_s6, 4  ;;  %s413_s26 = int_to_ptr.vmem [resolvable:$true] %s412_s26 }
  0x22   :  { %372 = vmatpush.bf16.msra.mxu3 %v555_v28 }
  0x23   :  { %290 = vmatpush.bf16.msra.mxu2 %v546_v14 }
  0x24   :  { %211 = vmatpush.bf16.msra.mxu1 %v537_v7 }
  0x26   :  { %373 = vmatpush.bf16.msra.mxu3 %v554_v29 }
  0x27   :  { %291 = vmatpush.bf16.msra.mxu2 %v545_v15 }
  0x28   :  { %212 = vmatpush.bf16.msra.mxu1 %v536_v8 }
  0x2a   :  { %374 = vmatpush.bf16.msra.mxu3 %v553_v30 }
  0x2b   :  { %292 = vmatpush.bf16.msra.mxu2 %v544_v16 }
  0x2c   :  { %213 = vmatpush.bf16.msra.mxu1 %v535_v9 }
  0x2e   :  { %375 = vmatpush.bf16.msra.mxu3 %v552_v31 }
  0x2f   :  { %293 = vmatpush.bf16.msra.mxu2 %v543_v18 }
  0x30   :  { %214 = vmatpush.bf16.msra.mxu1 %v534_v10 }
  0x32   :  { %376 = vmatpush.bf16.msra.mxu3 %v551_v32 }
  0x33   :  { %294 = vmatpush.bf16.msra.mxu2 %v542_v25 }
  0x34   :  { %215 = vmatpush.bf16.msra.mxu1 %v533_v11 }
  0x36   :  { %377 = vmatpush.bf16.msra.mxu3 %v550_v39 }
  0x37   :  { %295 = vmatpush.bf16.msra.mxu2 %v541_v26 }
  0x3a   :  { %378 = vmatpush.bf16.msra.mxu3 %v549_v40 }
  0x9b   :  { %v137_v20 = vpop.f32.mrf.mxu0 }
  0x9c   :  { %v138_v21 = vadd.f32 %v137_v20, %v111_v19 }
  0x9e   :  { %v141_v22 = vmax.f32 %v138_v21, 0.0 }
  0xa0   :  { %v142_v23 = vpack.c.bf16 %v141_v22, %v141_v22 }
  0xa2   :  { %216 = vmatmul.bf16.vlgmr.msra.gmra.mxu1 %v142_v23 }
  0xa3   :  { %v139_v24 = vpop.f32.mrf.mxu0 }
 0x11f   :  { %v217_v34 = vpop.f32.mrf.mxu1 }
 0x120   :  { %v218_v35 = vadd.f32 %v217_v34, %v159_v33 }
 0x122   :  { %v221_v36 = vmax.f32 %v218_v35, 0.0 }
 0x124   :  { %v222_v37 = vpack.c.bf16 %v221_v36, %v221_v36 }
 0x126   :  { %296 = vmatmul.bf16.vlgmr.msra.gmra.mxu2 %v222_v37 }
 0x127   :  { %v219_v38 = vpop.f32.mrf.mxu1 }
 0x1a9   :  { %v297_v42 = vpop.f32.mrf.mxu2 }
 0x1aa   :  { %v298_v43 = vadd.f32 %v297_v42, %v239_v41 }
 0x1ac   :  { %v301_v44 = vmax.f32 %v298_v43, 0.0 }
 0x1ae   :  { %v302_v45 = vpack.c.bf16 %v301_v44, %v301_v44 }
 0x1b0   :  { %379 = vmatmul.bf16.vlgmr.msra.gmra.mxu3 %v302_v45 }
 0x1b1   :  { %v299_v46 = vpop.f32.mrf.mxu2 }
 0x233   :  { %v380_v48 = vpop.f32.mrf.mxu3 }
 0x234   :  { %v381_v49 = vadd.f32 %v565_v47, %v380_v48 }
 0x236   :  { %384 = vmax.xlane.f32.xlu0 %v381_v49 }
 0x23b   :  { %v382_v50 = vpop.f32.mrf.mxu3 }
 0x2a9   :  { %v385_v51 = vpop.xlane.xlu0 %384 }
 0x2aa   :  { %v386_v52 = vsub.f32 %v381_v49, %v385_v51 }
 0x2ac   :  { %v387_v53 = vmul.f32 1.442695, %v386_v52 }
 0x2ae   :  { %566 = vpow2.f32 %v387_v53 }
 0x2b4   :  { %v567_v54 = vpop.eup %566 }
 0x2b5   :  { %389 = vadd.xlane.f32.xlu0 %v567_v54 }
 0x328   :  { %v390_v55 = vpop.xlane.xlu0 %389 }
 0x329   :  { %568 = vrcp.f32 %v390_v55  ;;  %v402_v59 = vand.u32 2147483648, %v390_v55  ;;  %v400_v61 = vand.u32 2147483647, %v390_v55  ;;  %vm396_vm2 = vweird.f32 %v390_v55 }
 0x32b   :  { %v403_v63 = vor.u32 1.1754944e-38, %v402_v59  ;;  %vm401_vm4 = vcmp.eq.f32.partialorder %v400_v61, 8.507059e+37 }
 0x32f   :  { %v569_v56 = vpop.eup %568 }
 0x330   :  { %v392_v57 = vmul.f32 %v569_v56, %v390_v55  ;;  %vm397_vm1 = vweird.f32 %v569_v56 }
 0x331   :  { %vm398_vm3 = vmor %vm396_vm2, %vm397_vm1 }
 0x332   :  { %v393_v58 = vsub.f32 1.0, %v392_v57 }
 0x334   :  { %v394_v60 = vmul.f32 %v569_v56, %v393_v58 }
 0x336   :  { %v395_v62 = vadd.f32 %v569_v56, %v394_v60 }
 0x338   :  { %v399_v0 = vsel %vm398_vm3, %v569_v56, %v395_v62 }
 0x339   :  { %v404_v1 = vsel %vm401_vm4, %v403_v63, %v399_v0 }
 0x33a   :  { %v405_v2 = vmul.f32 %v567_v54, %v404_v1 }
 0x33c   :  { %406 = vst [vmem:[#allocation11] sm:$0xff] %v405_v2 }
 0x33d   :  { %417 = dma.vmem_to_hbm [thread:$0]  %s413_s26, 128, %s415_s29, [#allocation4]  }
 0x33e   :  { %720 = dma.done.wait [#allocation4], 128  }
 0x33f   :  { %721 = vsyncadd [#allocation4], 4294967168 }
 0x340   :  { %422 = vsyncpa [#allocation3], 1 }
 0x341   :  { %423 = vsyncpa [#allocation6], 1 }
 0x342   :  { %424 = vsyncpa [#allocation9], 1 }
 0x343   :  { %425 = vsyncpa [#allocation4], 1 }

// kernel: tpu_custom_call.1
= control target key start
LH: loop header
LB: loop body
LE: loop exit
PB: predicated region body
PF: predicated region fallthrough
CT: control target
= control target key end

     0   :  { %12 = vsyncpa [#allocation3], 0  ;;  %s794_s0 = inlined_call_operand.hbm [shape: f32[8,32], index: 0, kind: input, shape index: {}]   ;;  %s795_s1 = inlined_call_operand.hbm [shape: bf16[32,128], index: 1, kind: input, shape index: {}]   ;;  %s796_s2 = inlined_call_operand.hbm [shape: bf16[128,128], index: 2, kind: input, shape index: {}]   ;;  %s797_s3 = inlined_call_operand.hbm [shape: bf16[128,128], index: 3, kind: input, shape index: {}]   ;;  %s798_s4 = inlined_call_operand.hbm [shape: bf16[128,128], index: 4, kind: input, shape index: {}]   ;;  %s799_s5 = inlined_call_operand.vmem [shape: f32[3,128], index: 5, kind: input, shape index: {}]   ;;  %s800_s6 = inlined_call_operand.vmem [shape: f32[1,128], index: 6, kind: input, shape index: {}]   ;;  %s801_s7 = inlined_call_operand.hbm [shape: f32[8,128], index: 7, kind: output, shape index: {}]  }
   0x1   :  { %13 = vsyncpa [#allocation6], 0 }
   0x2   :  { %14 = vsyncpa [#allocation9], 0  ;;  %s31_s26 = sshll.u32 %s795_s1, 4  ;;  %s32_s26 = int_to_ptr.hbm [resolvable:$true] %s31_s26 }
   0x3   :  { %15 = vsyncpa [#allocation4], 0  ;;  %s722_s27 = smov [#allocation5]   ;;  %s57_s8 = sshll.u32 %s797_s3, 4  ;;  %s58_s8 = int_to_ptr.hbm [resolvable:$true] %s57_s8 }
   0x4   :  { %s33_s28 = sshll.u32 %s722_s27, 4  ;;  %s723_s9 = smov 64   ;;  %s34_s28 = int_to_ptr.vmem [resolvable:$true] %s33_s28 }
   0x5   :  { %s724_s10 = smov 4   ;;  %s725_s11 = smov [#allocation8]  }
   0x6   :  { %39 = dma.hbm_to_vmem [thread:$0]  %s32_s26, 256, %s34_s28, [#allocation6], %s723_s9, %s723_s9, %s724_s10  }
   0x7   :  { %s59_s12 = sshll.u32 %s725_s11, 4  ;;  %s21_s15 = sshll.u32 %s794_s0, 4  ;;  %s60_s12 = int_to_ptr.vmem [resolvable:$true] %s59_s12  ;;  %s22_s15 = int_to_ptr.hbm [resolvable:$true] %s21_s15 }
   0x8   :  { %65 = dma.hbm_to_vmem [thread:$0]  %s58_s8, 1024, %s60_s12, [#allocation9], %s723_s9, %s723_s9, %s724_s10  }
   0x9   :  { %s44_s17 = sshll.u32 %s796_s2, 4  ;;  %s726_s18 = smov [#allocation2]   ;;  %s45_s17 = int_to_ptr.hbm [resolvable:$true] %s44_s17 }
   0xa   :  { %s23_s19 = sshll.u32 %s726_s18, 4  ;;  %s727_s3 = smov [#allocation7]   ;;  %s24_s19 = int_to_ptr.vmem [resolvable:$true] %s23_s19 }
   0xb   :  { %26 = dma.hbm_to_vmem [thread:$0]  %s22_s15, 128, %s24_s19, [#allocation3]  }
   0xc   :  { %s46_s20 = sshll.u32 %s727_s3, 4  ;;  %s70_s23 = sshll.u32 %s798_s4, 4  ;;  %s47_s20 = int_to_ptr.vmem [resolvable:$true] %s46_s20  ;;  %s71_s23 = int_to_ptr.hbm [resolvable:$true] %s70_s23 }
   0xd   :  { %52 = dma.hbm_to_vmem [thread:$0]  %s45_s17, 1024, %s47_s20, [#allocation6], %s723_s9, %s723_s9, %s724_s10  }
   0xe   :  { %s728_s0 = smov [#allocation10]  }
   0xf   :  { %s72_s24 = sshll.u32 %s728_s0, 4  ;;  %s73_s24 = int_to_ptr.vmem [resolvable:$true] %s72_s24 }
  0x10   :  { %78 = dma.hbm_to_vmem [thread:$0]  %s71_s23, 1024, %s73_s24, [#allocation9], %s723_s9, %s723_s9, %s724_s10  }
  0x11   :  { %714 = dma.done.wait [#allocation3], 128  }
  0x12   :  { %715 = vsyncadd [#allocation3], 4294967168 }
  0x13   :  { %716 = dma.done.wait [#allocation6], 1280  }
  0x14   :  { %717 = vsyncadd [#allocation6], 4294966016 }
  0x15   :  { %718 = dma.done.wait [#allocation9], 2048  }
  0x16   :  { %719 = vsyncadd [#allocation9], 4294965248  ;;  %v532_v0 = vld [vmem:[#allocation5 + $0x8] sm:$0xff]  ;;  %v531_v2 = vld [vmem:[#allocation5] sm:$0xff]  ;;  %vm124_vm0 = vcmask 261120   ;;  %s414_s29 = sshll.u32 %s801_s7, 4  ;;  %s415_s29 = int_to_ptr.hbm [resolvable:$true] %s414_s29 }
  0x17   :  { %v540_v1 = vld [vmem:[#allocation7 + $0x38] sm:$0xff]  ;;  %134 = vmatpush.bf16.msra.mxu0 %v532_v0  ;;  %v105_v3 = vld [vmem:[#allocation2] sm:$0xff]  ;;  %v539_v4 = vld [vmem:[#allocation7 + $0x30] sm:$0xff] }
  0x18   :  { %208 = vmatpush.bf16.msra.mxu1 %v540_v1  ;;  %v106_v5 = vpack.c.bf16 %v105_v3, %v105_v3  ;;  %v538_v6 = vld [vmem:[#allocation7 + $0x28] sm:$0xff]  ;;  %v537_v7 = vld [vmem:[#allocation7 + $0x20] sm:$0xff]  ;;  %v536_v8 = vld [vmem:[#allocation7 + $0x18] sm:$0xff] }
  0x19   :  { %v535_v9 = vld [vmem:[#allocation7 + $0x10] sm:$0xff]  ;;  %v534_v10 = vld [vmem:[#allocation7 + $0x8] sm:$0xff]  ;;  %v533_v11 = vld [vmem:[#allocation7] sm:$0xff] }
  0x1a   :  { %v548_v12 = vld [vmem:[#allocation8 + $0x38] sm:$0xff]  ;;  %v547_v13 = vld [vmem:[#allocation8 + $0x30] sm:$0xff]  ;;  %v546_v14 = vld [vmem:[#allocation8 + $0x28] sm:$0xff] }
  0x1b   :  { %135 = vmatpush.bf16.msra.mxu0 %v531_v2  ;;  %288 = vmatpush.bf16.msra.mxu2 %v548_v12  ;;  %v545_v15 = vld [vmem:[#allocation8 + $0x20] sm:$0xff]  ;;  %v544_v16 = vld [vmem:[#allocation8 + $0x18] sm:$0xff]  ;;  %v104_v17 = vld [vmem:[%s799_s5] sm:$0x7] }
  0x1c   :  { %209 = vmatpush.bf16.msra.mxu1 %v539_v4  ;;  %v543_v18 = vld [vmem:[#allocation8 + $0x10] sm:$0xff]  ;;  %v111_v19 = vperm.slane %v104_v17, 0  ;;  %v542_v25 = vld [vmem:[#allocation8 + $0x8] sm:$0xff]  ;;  %v541_v26 = vld [vmem:[#allocation8] sm:$0xff]  ;;  %v159_v33 = vperm.slane %v104_v17, 1  ;;  %v239_v41 = vperm.slane %v104_v17, 2 }
  0x1d   :  { %v556_v27 = vld [vmem:[#allocation10 + $0x38] sm:$0xff]  ;;  %v555_v28 = vld [vmem:[#allocation10 + $0x30] sm:$0xff]  ;;  %v554_v29 = vld [vmem:[#allocation10 + $0x28] sm:$0xff] }
  0x1e   :  { %434 = vmatmul.msk.bf16.vlgmr.msra.gmra.mxu0 %vm124_vm0, %v106_v5  ;;  %371 = vmatpush.bf16.msra.mxu3 %v556_v27  ;;  %v553_v30 = vld [vmem:[#allocation10 + $0x20] sm:$0xff]  ;;  %v552_v31 = vld [vmem:[#allocation10 + $0x18] sm:$0xff]  ;;  %v551_v32 = vld [vmem:[#allocation10 + $0x10] sm:$0xff] }
  0x1f   :  { %289 = vmatpush.bf16.msra.mxu2 %v547_v13  ;;  %v550_v39 = vld [vmem:[#allocation10 + $0x8] sm:$0xff]  ;;  %v549_v40 = vld [vmem:[#allocation10] sm:$0xff] }
  0x20   :  { %210 = vmatpush.bf16.msra.mxu1 %v538_v6  ;;  %v565_v47 = vld [vmem:[%s800_s6] ss:$0 sm:$0xff]  ;;  %s729_s6 = smov [#allocation11]  }
  0x21   :  { %s412_s26 = sshll.u32 %s729_s6, 4  ;;  %s413_s26 = int_to_ptr.vmem [resolvable:$true] %s412_s26 }
  0x22   :  { %372 = vmatpush.bf16.msra.mxu3 %v555_v28 }
  0x23   :  { %290 = vmatpush.bf16.msra.mxu2 %v546_v14 }
  0x24   :  { %211 = vmatpush.bf16.msra.mxu1 %v537_v7 }
  0x26   :  { %373 = vmatpush.bf16.msra.mxu3 %v554_v29 }
  0x27   :  { %291 = vmatpush.bf16.msra.mxu2 %v545_v15 }
  0x28   :  { %212 = vmatpush.bf16.msra.mxu1 %v536_v8 }
  0x2a   :  { %374 = vmatpush.bf16.msra.mxu3 %v553_v30 }
  0x2b   :  { %292 = vmatpush.bf16.msra.mxu2 %v544_v16 }
  0x2c   :  { %213 = vmatpush.bf16.msra.mxu1 %v535_v9 }
  0x2e   :  { %375 = vmatpush.bf16.msra.mxu3 %v552_v31 }
  0x2f   :  { %293 = vmatpush.bf16.msra.mxu2 %v543_v18 }
  0x30   :  { %214 = vmatpush.bf16.msra.mxu1 %v534_v10 }
  0x32   :  { %376 = vmatpush.bf16.msra.mxu3 %v551_v32 }
  0x33   :  { %294 = vmatpush.bf16.msra.mxu2 %v542_v25 }
  0x34   :  { %215 = vmatpush.bf16.msra.mxu1 %v533_v11 }
  0x36   :  { %377 = vmatpush.bf16.msra.mxu3 %v550_v39 }
  0x37   :  { %295 = vmatpush.bf16.msra.mxu2 %v541_v26 }
  0x3a   :  { %378 = vmatpush.bf16.msra.mxu3 %v549_v40 }
  0x9b   :  { %v137_v20 = vpop.f32.mrf.mxu0 }
  0x9c   :  { %v138_v21 = vadd.f32 %v137_v20, %v111_v19 }
  0x9e   :  { %v141_v22 = vmax.f32 %v138_v21, 0.0 }
  0xa0   :  { %v142_v23 = vpack.c.bf16 %v141_v22, %v141_v22 }
  0xa2   :  { %216 = vmatmul.bf16.vlgmr.msra.gmra.mxu1 %v142_v23 }
  0xa3   :  { %v139_v24 = vpop.f32.mrf.mxu0 }
 0x11f   :  { %v217_v34 = vpop.f32.mrf.mxu1 }
 0x120   :  { %v218_v35 = vadd.f32 %v217_v34, %v159_v33 }
 0x122   :  { %v221_v36 = vmax.f32 %v218_v35, 0.0 }
 0x124   :  { %v222_v37 = vpack.c.bf16 %v221_v36, %v221_v36 }
 0x126   :  { %296 = vmatmul.bf16.vlgmr.msra.gmra.mxu2 %v222_v37 }
 0x127   :  { %v219_v38 = vpop.f32.mrf.mxu1 }
 0x1a9   :  { %v297_v42 = vpop.f32.mrf.mxu2 }
 0x1aa   :  { %v298_v43 = vadd.f32 %v297_v42, %v239_v41 }
 0x1ac   :  { %v301_v44 = vmax.f32 %v298_v43, 0.0 }
 0x1ae   :  { %v302_v45 = vpack.c.bf16 %v301_v44, %v301_v44 }
 0x1b0   :  { %379 = vmatmul.bf16.vlgmr.msra.gmra.mxu3 %v302_v45 }
 0x1b1   :  { %v299_v46 = vpop.f32.mrf.mxu2 }
 0x233   :  { %v380_v48 = vpop.f32.mrf.mxu3 }
 0x234   :  { %v381_v49 = vadd.f32 %v565_v47, %v380_v48 }
 0x236   :  { %384 = vmax.xlane.f32.xlu0 %v381_v49 }
 0x23b   :  { %v382_v50 = vpop.f32.mrf.mxu3 }
 0x2a9   :  { %v385_v51 = vpop.xlane.xlu0 %384 }
 0x2aa   :  { %v386_v52 = vsub.f32 %v381_v49, %v385_v51 }
 0x2ac   :  { %v387_v53 = vmul.f32 1.442695, %v386_v52 }
 0x2ae   :  { %566 = vpow2.f32 %v387_v53 }
 0x2b4   :  { %v567_v54 = vpop.eup %566 }
 0x2b5   :  { %389 = vadd.xlane.f32.xlu0 %v567_v54 }
 0x328   :  { %v390_v55 = vpop.xlane.xlu0 %389 }
 0x329   :  { %568 = vrcp.f32 %v390_v55  ;;  %v402_v59 = vand.u32 2147483648, %v390_v55  ;;  %v400_v61 = vand.u32 2147483647, %v390_v55  ;;  %vm396_vm2 = vweird.f32 %v390_v55 }
 0x32b   :  { %v403_v63 = vor.u32 1.1754944e-38, %v402_v59  ;;  %vm401_vm4 = vcmp.eq.f32.partialorder %v400_v61, 8.507059e+37 }
 0x32f   :  { %v569_v56 = vpop.eup %568 }
 0x330   :  { %v392_v57 = vmul.f32 %v569_v56, %v390_v55  ;;  %vm397_vm1 = vweird.f32 %v569_v56 }
 0x331   :  { %vm398_vm3 = vmor %vm396_vm2, %vm397_vm1 }
 0x332   :  { %v393_v58 = vsub.f32 1.0, %v392_v57 }
 0x334   :  { %v394_v60 = vmul.f32 %v569_v56, %v393_v58 }
 0x336   :  { %v395_v62 = vadd.f32 %v569_v56, %v394_v60 }
 0x338   :  { %v399_v0 = vsel %vm398_vm3, %v569_v56, %v395_v62 }
 0x339   :  { %v404_v1 = vsel %vm401_vm4, %v403_v63, %v399_v0 }
 0x33a   :  { %v405_v2 = vmul.f32 %v567_v54, %v404_v1 }
 0x33c   :  { %406 = vst [vmem:[#allocation11] sm:$0xff] %v405_v2 }
 0x33d   :  { %417 = dma.vmem_to_hbm [thread:$0]  %s413_s26, 128, %s415_s29, [#allocation4]  }
 0x33e   :  { %720 = dma.done.wait [#allocation4], 128  }
 0x33f   :  { %721 = vsyncadd [#allocation4], 4294967168 }
 0x340   :  { %422 = vsyncpa [#allocation3], 1 }
 0x341   :  { %423 = vsyncpa [#allocation6], 1 }
 0x342   :  { %424 = vsyncpa [#allocation9], 1 }
 0x343   :  { %425 = vsyncpa [#allocation4], 1 }

</bundles_post_ra>
